<compile_context>
chip_gen: v5e
topology: v5e:2x2
jax: 0.10.0
libtpu: 0.0.40
codegen_flags: <defaults>
</compile_context>

<pallas_src>
import functools
import math

import jax
import jax.numpy as jnp
from jax.experimental import pallas as pl
from jax.experimental.pallas import tpu as pltpu


# Large finite negative (instead of finfo.min) so masked logits never turn
# into inf/NaN through the online-softmax recurrence.
MASK_VALUE = -0.7 * float(jnp.finfo(jnp.float32).max)


def _pick_n_tile(total, target):
    """Largest lane-aligned (multiple of 128) divisor of `total` <= target."""
    if total <= target:
        return total
    m = (target // 128) * 128
    while m >= 128:
        if total % m == 0:
            return m
        m -= 128
    return total  # fall back: keep the whole N axis resident


def _vmem_limit_bytes(pipeline_bytes, resident_bytes=0):
    """Explicit VMEM budget: double-buffered pipeline blocks + resident scratch.

    v5e default scoped limit is 16 MiB, v6e/v7x 32 MiB; v7x physical is only
    64 MiB, so block sizes should keep this request under 64 MiB there.
    """
    need = 2 * pipeline_bytes + resident_bytes + (2 << 20)
    return int(min(max(need, 32 << 20), 128 << 20))


def _last_kv_tile(qi, tq, tk):
    return (qi * tq + tq - 1) // tk


def _clamped_kv_index(qi, ki, tq, tk):
    # Causally-dead kv tiles map to the last contributing tile so the
    # pipeline sees an unchanged block index and skips the DMA.
    return jnp.minimum(ki, _last_kv_tile(qi, tq, tk))


# ----------------------------- Kernel 1 ------------------------------------


def qkv_proj_kernel(x_ref, w_ref, b_ref, qkv_ref):
    """One (tp, tn) tile of qkv = x @ Wqkv + bqkv (scale pre-folded into W)."""
    x = x_ref[0]                                            # (tp, d), compute dtype
    acc = jnp.dot(x, w_ref[...], preferred_element_type=jnp.float32)  # (tp, tn) f32
    qkv_ref[0] = (acc + b_ref[...]).astype(qkv_ref.dtype)   # lane-dense store


# ----------------------------- Kernel 2 ------------------------------------


def flash_attn_kernel(q_ref, k_ref, v_ref, bias_ref, wout_ref, bout_ref, out_ref,
                      m_ref, l_ref, acc_ref, y_ref, *,
                      tq, tk, n_heads, compute_dtype, exp_dtype, approx_recip,
                      slab_layout):
    qi = pl.program_id(1)
    h = pl.program_id(2)
    ki = pl.program_id(3)

    q_start = qi * tq
    q_end = q_start + (tq - 1)          # last global query row of this q tile
    k_start = ki * tk
    contributes = k_start <= q_end      # causal: tile has >= 1 unmasked column
    last_ki = q_end // tk               # last kv tile that contributes

    # NOTE: m is initialised to the finite MASK_VALUE (not -inf).  This is
    # safe ONLY because ki=0 always contributes under the causal mask
    # (column 0 is visible to every query row), so every row sees at least
    # one real logit before normalisation.  Do not change the ki start
    # (e.g. triangular-grid optimization) without revisiting this init.
    @pl.when(ki == 0)
    def _init_head():
        m_ref[...] = jnp.full_like(m_ref, MASK_VALUE)
        l_ref[...] = jnp.zeros_like(l_ref)
        acc_ref[...] = jnp.zeros_like(acc_ref)

    @pl.when(jnp.logical_and(h == 0, ki == 0))
    def _init_out_accum():
        y_ref[...] = jnp.zeros_like(y_ref)

    @pl.when(contributes)
    def _online_softmax_step():
        if slab_layout:
            q = q_ref[0]                # (tq, dh), pre-scaled, compute dtype
            k = k_ref[0]                # (tk, dh)
            v = v_ref[0]                # (tk, dh)
        else:
            q = q_ref[0, 0]
            k = k_ref[0, 0]
            v = v_ref[0, 0]
        # Contract last dims of both operands: no K^T materialization.
        s = jax.lax.dot_general(q, k, (((1,), (1,)), ((), ())),
                                preferred_element_type=jnp.float32)    # (tq, tk)
        s = s + bias_ref[0, 0]          # additive attn_bias (before masking)
        row = q_start + jax.lax.broadcasted_iota(jnp.int32, (tq, tk), 0)
        col = k_start + jax.lax.broadcasted_iota(jnp.int32, (tq, tk), 1)
        s = jnp.where(col > row, MASK_VALUE, s)

        m_prev = m_ref[...]                                            # (tq, 1) f32
        m_new = jnp.maximum(m_prev, jnp.max(s, axis=-1, keepdims=True))
        corr = jnp.exp(m_prev - m_new)                                 # f32, tiny
        # exp on the (tq, tk) tile is the EUP-saturating op for small dh; the
        # bf16 EUP path (v6e/v7x) roughly doubles its throughput.  m/l stay f32.
        p = jnp.exp((s - m_new).astype(exp_dtype))
        l_ref[...] = corr * l_ref[...] + jnp.sum(p, axis=-1, keepdims=True,
                                                 dtype=jnp.float32)
        acc_ref[...] = corr * acc_ref[...] + jnp.dot(
            p.astype(compute_dtype), v, preferred_element_type=jnp.float32)
        m_ref[...] = m_new

    @pl.when(ki == last_ki)
    def _fold_head_into_out_proj():
        # Output projection as a reduction over heads: no lane-axis concat.
        inv_l = pl.reciprocal(l_ref[...], approx=approx_recip)
        y_h = (acc_ref[...] * inv_l).astype(compute_dtype)             # (tq, dh)
        y_ref[...] += jnp.dot(y_h, wout_ref[...],
                              preferred_element_type=jnp.float32)      # (tq, d)

    @pl.when(jnp.logical_and(h == n_heads - 1, ki == last_ki))
    def _write_out():
        out_ref[0] = (y_ref[...] + bout_ref[...]).astype(out_ref.dtype)


# ------------------------------ Wrapper ------------------------------------


def multi_head_attention(x, wqkv, bqkv, wout, bout, attn_bias, n_heads, *,
                         compute_dtype=jnp.bfloat16,
                         q_block=256, kv_block=512,
                         proj_seq_block=256, proj_n_block=512,
                         exp_in_bf16=None):
    """Forward pass of replit MultiHeadAttention (kv_cache=None path).

    v5e note: pass kv_block=256 and exp_in_bf16=False (no bf16 VPU/EUP path).
    v7x note: keep b * (t/q_block) >= 2 so both TensorCores get work.
    """
    b, t, d = x.shape
    assert d % n_heads == 0
    dh = d // n_heads
    assert attn_bias.shape == (1, n_heads, t, t)
    softmax_scale = 1.0 / math.sqrt(dh)
    compute_dtype = jnp.dtype(compute_dtype)
    if exp_in_bf16 is None:
        exp_in_bf16 = compute_dtype == jnp.dtype(jnp.bfloat16)
    exp_dtype = jnp.dtype(jnp.bfloat16) if exp_in_bf16 else jnp.dtype(jnp.float32)
    # Exact reciprocal only when doing full-f32 parity checks.
    approx_recip = compute_dtype != jnp.dtype(jnp.float32)

    tp = min(proj_seq_block, t)
    tq = min(q_block, t)
    tk = min(kv_block, t)
    assert t % tp == 0 and t % tq == 0 and t % tk == 0, "seq must divide tiles"
    d3 = 3 * d
    tn = _pick_n_tile(d3, proj_n_block)
    cs = compute_dtype.itemsize

    # ---- Host-side (one-time) weight prep ----
    # Fold the softmax scale into the q columns of Wqkv/bqkv and pre-cast the
    # streamed tensors (weights, attn_bias, x) to the compute dtype.
    col_scale = jnp.concatenate([
        jnp.full((d,), softmax_scale, dtype=jnp.float32),
        jnp.ones((2 * d,), dtype=jnp.float32)])
    wqkv_c = (wqkv.astype(jnp.float32) * col_scale[None, :]).astype(compute_dtype)
    bqkv_c = bqkv.astype(jnp.float32) * col_scale[None, :]          # small, f32
    x_c = x.astype(compute_dtype)
    wout_c = wout.astype(compute_dtype)
    bias_c = attn_bias.astype(compute_dtype)
    bout_c = bout.astype(jnp.float32)

    # ---- Kernel 1: N-tiled QKV projection -> lane-dense (b, t, 3d) slab ----
    # Grid order (j, b, i): the (d, tn) weight slab has a constant index over
    # (b, i), so it is fetched once per j instead of being re-streamed.
    k1_pipeline = (tp * d + d * tn + tp * tn) * cs + tn * 4
    qkv = pl.pallas_call(
        qkv_proj_kernel,
        out_shape=jax.ShapeDtypeStruct((b, t, d3), compute_dtype),
        grid=(d3 // tn, b, t // tp),
        in_specs=[
            pl.BlockSpec((1, tp, d), lambda j, bi, i: (bi, i, 0)),    # x tile
            pl.BlockSpec((d, tn), lambda j, bi, i: (0, j)),           # Wqkv slab
            pl.BlockSpec((1, tn), lambda j, bi, i: (0, j)),           # bqkv slab
        ],
        out_specs=pl.BlockSpec((1, tp, tn), lambda j, bi, i: (bi, i, j)),
        compiler_params=pltpu.CompilerParams(
            dimension_semantics=("parallel", "parallel", "parallel"),
            vmem_limit_bytes=_vmem_limit_bytes(k1_pipeline)),
    )(x_c, wqkv_c, bqkv_c)

    # ---- Head selection layout for kernel 2 ----
    slab_layout = (dh % 128 == 0)
    clamp = functools.partial(_clamped_kv_index, tq=tq, tk=tk)
    if slab_layout:
        # Slice q/k/v head tiles straight out of the slab via the index_map
        # (lane-aligned, zero data movement).
        q_in, k_in, v_in = qkv, qkv, qkv
        q_spec = pl.BlockSpec((1, tq, dh), lambda bi, qi, h, ki: (bi, qi, h))
        k_spec = pl.BlockSpec(
            (1, tk, dh), lambda bi, qi, h, ki: (bi, clamp(qi, ki), n_heads + h))
        v_spec = pl.BlockSpec(
            (1, tk, dh), lambda bi, qi, h, ki: (bi, clamp(qi, ki), 2 * n_heads + h))
    else:
        # dh is not a multiple of 128: build a head-major layout once in XLA
        # (one extra HBM pass) so the kernel never does sub-128-lane slicing.
        qh, kh, vh = jnp.split(qkv, 3, axis=-1)
        def to_head_major(a):
            return a.reshape(b, t, n_heads, dh).transpose(0, 2, 1, 3)
        q_in, k_in, v_in = to_head_major(qh), to_head_major(kh), to_head_major(vh)
        q_spec = pl.BlockSpec((1, 1, tq, dh), lambda bi, qi, h, ki: (bi, h, qi, 0))
        k_spec = pl.BlockSpec(
            (1, 1, tk, dh), lambda bi, qi, h, ki: (bi, h, clamp(qi, ki), 0))
        v_spec = pl.BlockSpec(
            (1, 1, tk, dh), lambda bi, qi, h, ki: (bi, h, clamp(qi, ki), 0))

    bias_spec = pl.BlockSpec(
        (1, 1, tq, tk), lambda bi, qi, h, ki: (0, h, qi, clamp(qi, ki)))

    # ---- Kernel 2: flash attention + fused output projection ----
    k2_pipeline = ((tq * dh + 2 * tk * dh + tq * tk + dh * d) * cs
                   + d * 4 + tq * d * jnp.dtype(x.dtype).itemsize)
    k2_scratch = (2 * tq + tq * dh + tq * d) * 4
    out = pl.pallas_call(
        functools.partial(flash_attn_kernel, tq=tq, tk=tk, n_heads=n_heads,
                          compute_dtype=compute_dtype, exp_dtype=exp_dtype,
                          approx_recip=approx_recip, slab_layout=slab_layout),
        out_shape=jax.ShapeDtypeStruct((b, t, d), x.dtype),
        grid=(b, t // tq, n_heads, t // tk),
        in_specs=[
            q_spec, k_spec, v_spec, bias_spec,
            pl.BlockSpec((dh, d), lambda bi, qi, h, ki: (h, 0)),   # Wout row-slice
            pl.BlockSpec((1, d), lambda bi, qi, h, ki: (0, 0)),    # bout
        ],
        out_specs=pl.BlockSpec((1, tq, d), lambda bi, qi, h, ki: (bi, qi, 0)),
        scratch_shapes=[
            pltpu.VMEM((tq, 1), jnp.float32),    # m (running max)
            pltpu.VMEM((tq, 1), jnp.float32),    # l (running denom)
            pltpu.VMEM((tq, dh), jnp.float32),   # per-head context accumulator
            pltpu.VMEM((tq, d), jnp.float32),    # output-projection accumulator
        ],
        compiler_params=pltpu.CompilerParams(
            dimension_semantics=("parallel", "parallel", "arbitrary", "arbitrary"),
            vmem_limit_bytes=_vmem_limit_bytes(k2_pipeline, k2_scratch)),
    )(q_in, k_in, v_in, bias_c, wout_c, bout_c)
    return out


# ------------------------------ Reference ----------------------------------


def reference_forward(x, wqkv, bqkv, wout, bout, attn_bias, n_heads):
    """Pure-JAX replica of the PyTorch forward for correctness checking."""
    b, t, d = x.shape
    dh = d // n_heads
    scale = 1.0 / math.sqrt(dh)
    qkv = x @ wqkv + bqkv[0]
    q, k, v = jnp.split(qkv, 3, axis=-1)
    q = q.reshape(b, t, n_heads, dh).transpose(0, 2, 1, 3)       # b h s d
    k = k.reshape(b, t, n_heads, dh).transpose(0, 2, 3, 1)       # b h d s
    v = v.reshape(b, t, n_heads, dh).transpose(0, 2, 1, 3)       # b h s d
    s = jnp.einsum('bhqd,bhdk->bhqk', q, k) * scale + attn_bias
    mask = jnp.triu(jnp.ones((t, t), dtype=bool), 1)
    s = jnp.where(mask[None, None], jnp.finfo(jnp.float32).min, s)
    p = jax.nn.softmax(s, axis=-1)
    y = jnp.einsum('bhqk,bhkd->bhqd', p, v).transpose(0, 2, 1, 3).reshape(b, t, d)
    return y @ wout + bout[0]


if __name__ == "__main__":
    def make_inputs(key, b, t, d_model, n_heads):
        kx, kw1, kb1, kw2, kb2, kbias = jax.random.split(key, 6)
        x = jax.random.normal(kx, (b, t, d_model), dtype=jnp.float32)
        wqkv = jax.random.normal(kw1, (d_model, 3 * d_model), jnp.float32) / math.sqrt(d_model)
        bqkv = jax.random.normal(kb1, (1, 3 * d_model), jnp.float32) * 0.01
        wout = jax.random.normal(kw2, (d_model, d_model), jnp.float32) / math.sqrt(d_model)
        bout = jax.random.normal(kb2, (1, d_model), jnp.float32) * 0.01
        attn_bias = jax.random.normal(kbias, (1, n_heads, t, t), jnp.float32) * 0.1
        return x, wqkv, bqkv, wout, bout, attn_bias

    key = jax.random.PRNGKey(0)
    key1, key2 = jax.random.split(key)

    # Case 1: module-scale shapes (batch=2, seq=8, d_model=32, heads=4;
    # d_head=8 -> head-major fallback path).
    args1 = make_inputs(key1, 2, 8, 32, 4)
    ref1 = reference_forward(*args1, 4)
    out1_f32 = jax.block_until_ready(
        multi_head_attention(*args1, 4, compute_dtype=jnp.float32))
    assert jnp.allclose(out1_f32, ref1, atol=1e-4, rtol=1e-4), "case1 f32 mismatch"
    out1_bf16 = jax.block_until_ready(
        multi_head_attention(*args1, 4, compute_dtype=jnp.bfloat16))
    assert jnp.allclose(out1_bf16, ref1, atol=1e-1, rtol=1e-1), "case1 bf16 mismatch"

    # Case 2: d_head=128 -> lane-dense slab path (head slices selected via
    # BlockSpec index_maps directly from the (b, t, 3d) projection output).
    args2 = make_inputs(key2, 2, 16, 256, 2)
    ref2 = reference_forward(*args2, 2)
    out2_f32 = jax.block_until_ready(
        multi_head_attention(*args2, 2, compute_dtype=jnp.float32))
    assert jnp.allclose(out2_f32, ref2, atol=1e-4, rtol=1e-4), "case2 f32 mismatch"
    out2_bf16 = jax.block_until_ready(
        multi_head_attention(*args2, 2, compute_dtype=jnp.bfloat16))
    assert jnp.allclose(out2_bf16, ref2, atol=1e-1, rtol=1e-1), "case2 bf16 mismatch"

    print("KERNEL_OK")
</pallas_src>

<mosaic_0001>
module attributes {stable_mosaic.version = 11 : i64} {
  func.func @qkv_proj_kernel(%arg0: i32, %arg1: i32, %arg2: i32, %arg3: memref<1x8x32xf32, #tpu.memory_space<vmem>>, %arg4: memref<32x96xf32, #tpu.memory_space<vmem>>, %arg5: memref<1x96xf32, #tpu.memory_space<vmem>>, %arg6: memref<1x8x96xf32, #tpu.memory_space<vmem>>) attributes {dimension_semantics = [#tpu.dimension_semantics<parallel>, #tpu.dimension_semantics<parallel>, #tpu.dimension_semantics<parallel>], iteration_bounds = array<i64: 1, 2, 1>, scalar_prefetch = 0 : i64, scratch_operands = 0 : i64, tpu.core_type = #tpu.core_type<tc>, window_params = [{transform_indices = @transform_0, window_bounds = array<i64: 1, 8, 32>}, {transform_indices = @transform_1, window_bounds = array<i64: 32, 96>}, {transform_indices = @transform_2, window_bounds = array<i64: 1, 96>}, {transform_indices = @transform_3, window_bounds = array<i64: 1, 8, 96>}]} {
    %c0 = arith.constant 0 : index
    %c0_0 = arith.constant 0 : index
    %c0_1 = arith.constant 0 : index
    %0 = vector.load %arg3[%c0, %c0_0, %c0_1] : memref<1x8x32xf32, #tpu.memory_space<vmem>>, vector<1x8x32xf32>
    %1 = vector.shape_cast %0 : vector<1x8x32xf32> to vector<8x32xf32>
    %c0_2 = arith.constant 0 : index
    %c0_3 = arith.constant 0 : index
    %2 = vector.load %arg4[%c0_2, %c0_3] : memref<32x96xf32, #tpu.memory_space<vmem>>, vector<32x96xf32>
    %cst = arith.constant dense<0.000000e+00> : vector<8x96xf32>
    %3 = tpu.matmul %1, %2, %cst {dimension_numbers = #tpu.dot_dimension_numbers<[1], [0], [0], [1], [0, 0, 1, 1], [], []>} : vector<8x32xf32>, vector<32x96xf32>, vector<8x96xf32> -> vector<8x96xf32>
    %c0_4 = arith.constant 0 : index
    %c0_5 = arith.constant 0 : index
    %4 = vector.load %arg5[%c0_4, %c0_5] : memref<1x96xf32, #tpu.memory_space<vmem>>, vector<1x96xf32>
    %5 = vector.broadcast %4 : vector<1x96xf32> to vector<8x96xf32>
    %6 = arith.addf %3, %5 : vector<8x96xf32>
    %c0_6 = arith.constant 0 : index
    %c0_7 = arith.constant 0 : index
    %c0_8 = arith.constant 0 : index
    %7 = vector.load %arg6[%c0_6, %c0_7, %c0_8] : memref<1x8x96xf32, #tpu.memory_space<vmem>>, vector<1x8x96xf32>
    %8 = vector.shape_cast %7 : vector<1x8x96xf32> to vector<8x96xf32>
    %9 = vector.shape_cast %6 : vector<8x96xf32> to vector<1x8x96xf32>
    tpu.vector_store %arg6[%c0_6, %c0_7, %c0_8], %9 {strides = array<i32>} : memref<1x8x96xf32, #tpu.memory_space<vmem>>, vector<1x8x96xf32>,
    return
  }
  func.func @transform_0(%arg0: i32, %arg1: i32, %arg2: i32) -> (i32, i32, i32) {
    %c0_i32 = arith.constant 0 : i32
    %c0_i32_0 = arith.constant 0 : i32
    return %arg1, %arg2, %c0_i32 : i32, i32, i32
  }
  func.func @transform_1(%arg0: i32, %arg1: i32, %arg2: i32) -> (i32, i32) {
    %c0_i32 = arith.constant 0 : i32
    %c0_i32_0 = arith.constant 0 : i32
    return %c0_i32, %arg0 : i32, i32
  }
  func.func @transform_2(%arg0: i32, %arg1: i32, %arg2: i32) -> (i32, i32) {
    %c0_i32 = arith.constant 0 : i32
    %c0_i32_0 = arith.constant 0 : i32
    return %c0_i32, %arg0 : i32, i32
  }
  func.func @transform_3(%arg0: i32, %arg1: i32, %arg2: i32) -> (i32, i32, i32) {
    %c0_i32 = arith.constant 0 : i32
    return %arg1, %arg2, %arg0 : i32, i32, i32
  }
}

</mosaic_0001>

<bundles_post_ra>
// kernel: tpu_custom_call.1
= control target key start
LH: loop header
LB: loop body
LE: loop exit
PB: predicated region body
PF: predicated region fallthrough
CT: control target
= control target key end

     0   :  { %8 = vsyncpa [#allocation3], 0  ;;  %s823_s0 = inlined_call_operand.hbm [shape: f32[2,8,32], index: 0, kind: input, shape index: {}]   ;;  %s824_s1 = inlined_call_operand.hbm [shape: f32[32,96], index: 1, kind: input, shape index: {}]   ;;  %s825_s2 = inlined_call_operand.vmem [shape: f32[1,96], index: 2, kind: input, shape index: {}]   ;;  %s826_s3 = inlined_call_operand.hbm [shape: f32[2,8,96], index: 3, kind: output, shape index: {}]  }
   0x1   :  { %10 = vsyncpa [#allocation3 + $0x1], 0 }
   0x2   :  { %11 = vsyncpa [#allocation6], 0 }
   0x3   :  { %12 = vsyncpa [#allocation4], 0 }
   0x4   :  { %14 = vsyncpa [#allocation4 + $0x1], 0  ;;  %s677_s12 = smov 0   ;;  %s679_s13 = smov 0  }
   0x5   :  { %s681_s14 = smov 0   ;;  %s683_s15 = smov 0  }
   0x6   :  { %s685_s16 = smov 0   ;;  %s687_s17 = smov 0  }
   0x7 LB: > { %s413_s18 = sadd.s32 4294967295, %s652_s17   ;;  %p415_p0 = scmp.ge.s32.totalorder %s652_s17, 1  ;;  %s652_s17 = sphi %s687_s17, %s20_s17   ;;  %s648_s16 = sphi %s685_s16, %s837_s16   ;;  %s644_s15 = sphi %s683_s15, %s836_s15   ;;  %s640_s14 = sphi %s681_s14, %s835_s14   ;;  %s636_s13 = sphi %s679_s13, %s834_s13   ;;  %s632_s12 = sphi %s677_s12, %s833_s12  }
   0x8   : > { %p709_p1 = scmp.eq.s32.totalorder %s413_s18, 0  ;;  %p154_p2 = scmp.lt.s32.totalorder %s652_s17, 3 }
   0x9   : > { %s167_s22 = sshll.u32 %s824_s1, 4  ;;  %s654_s24 = smov [#allocation5]   ;;  %s168_s22 = int_to_ptr.hbm [resolvable:$true] %s167_s22 }
   0xa   : > { %p717_p3 = pnand %p415_p0, %p154_p2  ;;  %s169_s25 = sshll.u32 %s654_s24, 4  ;;  %s170_s25 = int_to_ptr.vmem [resolvable:$true] %s169_s25 }
   0xb   : > { %p418_p6 = scmp.ge.s32.totalorder %s652_s17, 2  ;;  %s655_s26 = smov 128  }
   0xc   : > { %p438_p4 = pneg %p717_p3  ;;  %s656_s27 = smov 8  }
   0xd   : > { %s414_s28 = sadd.s32 4294967294, %s652_s17   ;;  %s35_s29 = sadd.s32 1, %s648_s16 }
   0xe   : > { %p439_p5 = pnand %p438_p4, %p709_p1  ;;  %s48_s30 = sadd.s32 1, %s640_s14 }
   0xf   : > { %p37_p7 = scmp.ge.s32.totalorder %s35_s29, 2  ;;  %p55_p8 = scmp.ne.s32.totalorder %s640_s14, %s636_s13 }
  0x10   : > { %441 = dma.hbm_to_vmem [thread:$0]  (!%p439_p5), %s168_s22, 512, %s170_s25, [#allocation6], %s655_s26, %s655_s26, %s656_s27  }
  0x11   : > { %p56_p9 = scmp.eq.s32.totalorder %s652_s17, 0  ;;  %p61_p10 = scmp.ne.s32.totalorder %s636_s13, %s632_s12 }
  0x12   : > { %s839_s29 = smov (%p37_p7, %s35_s29), 0  ;;  %p141_p13 = scmp.eq.s32.totalorder %s413_s18, 1 }
  0x13   : > { %p736_p11 = por %p56_p9, %p55_p8  ;;  %p742_p12 = por %p709_p1, %p61_p10 }
  0x14   : > { %s43_s6 = ssub.s32 %s648_s16, %s839_s29  ;;  %p147_p2 = scmp.eq.s32.totalorder %s414_s28, 1 }
  0x15   : > { %p46_p0 = scmp.eq.s32.totalorder %s43_s6, 0  ;;  %p748_p4 = por %p141_p13, %p55_p8 }
  0x16   : > { %p451_p5 = scmp.lt.s32.totalorder %s652_s17, 2  ;;  %p756_p7 = por %p147_p2, %p61_p10 }
  0x17   : > { %s754_s8 = scalar_select %p46_p0, %s640_s14, %s48_s30  }
  0x18   : > { %s189_s10 = sand.u32 1, %s640_s14   ;;  %s420_s20 = sshll.u32 %s648_s16, 3 }
  0x19   : > { %s419_s11 = sshll.u32 %s189_s10, 3  ;;  %s198_s18 = scalar_lea.hbm %s823_s0, %s420_s20 }
  0x1a   : > { %s193_s24 = scalar_lea.vmem [#allocation2], %s419_s11  ;;  %s200_s26 = sshll.u32 %s198_s18, 4  ;;  %s201_s26 = int_to_ptr.hbm [resolvable:$true] %s200_s26 }
  0x1b   : > { %s202_s25 = sshll.u32 %s193_s24, 4  ;;  %p443_p8 = pnand %p451_p5, %p736_p11  ;;  %s203_s25 = int_to_ptr.vmem [resolvable:$true] %s202_s25 }
  0x1c   : > { %s190_s27 = scalar_lea.sflag [#allocation3], %s189_s10  ;;  %211 = sbr.rel (%p717_p3) target bundleno = 175 (0xaf), region = 32 }
  0x1d   : > { %445 = dma.hbm_to_vmem [thread:$0]  (!%p443_p8), %s201_s26, 128, %s203_s25, %s190_s27  }
  0x1e   : > { %s770_s28 = sand.u32 (!%p717_p3), 1, %s636_s13  }
  0x1f   : > { %s422_s30 = sshll.u32 (!%p717_p3), %s770_s28, 3  ;;  %s214_s6 = scalar_lea.sflag (!%p717_p3), [#allocation3], %s770_s28 }
  0x20   : > { %s217_s11 = scalar_lea.vmem (!%p717_p3), [#allocation2], %s422_s30 }
  0x21   : > { %619 = dma.done.wait (%p742_p12), %s214_s6, 128  }
  0x22   : > { %621 = vsyncadd (%p742_p12), %s214_s6, 4294967168 }
  0x23   : > { %623 = dma.done.wait (%p709_p1), [#allocation6], 512  }
  0x24   : > { %625 = vsyncadd (%p709_p1), [#allocation6], 4294966784  ;;  %v256_v0 = vld [vmem:[#allocation5 + $0x18] sm:$0xff]  ;;  %v255_v1 = vld [vmem:[#allocation5 + $0x10] sm:$0xff]  ;;  %vm261_vm0 = vcmask 261120   ;;  %s427_s23 = sshll.u32 %s644_s15, 3 }
  0x25   : > { %277 = vmatpush.msra.mxu0 %v256_v0  ;;  %v254_v2 = vld [vmem:[#allocation5 + $0x8] sm:$0xff]  ;;  %v253_v3 = vld [vmem:[#allocation5] sm:$0xff]  ;;  %v252_v4 = vld [vmem:[%s217_s11] sm:$0xff]  ;;  %s300_s10 = scalar_lea.hbm %s826_s3, %s427_s23  ;;  %s248_s21 = scalar_lea.vmem [#allocation7], %s422_s30  ;;  %vm285_vm1 = vcmask 785408  }
  0x26   : > { %v505_v5 = vld [vmem:[%s825_s2] ss:$0 sm:$0xff]  ;;  %s302_s22 = sshll.u32 %s248_s21, 4  ;;  %s304_s18 = sshll.u32 %s300_s10, 4  ;;  %s303_s22 = int_to_ptr.vmem [resolvable:$true] %s302_s22  ;;  %s305_s18 = int_to_ptr.hbm [resolvable:$true] %s304_s18 }
  0x27   : > { %278 = vmatpush.msra.mxu0 %v255_v1  ;;  %s288_s24 = scalar_lea.sflag [#allocation4], %s770_s28  ;;  %s580_s15 = sshra.s32 %s305_s18, 4  ;;  %s581_s15 = int_to_ptr.hbm [resolvable:$true] %s580_s15 }
  0x28   : > { %s582_s25 = scalar_lea.hbm %s581_s15, 8  ;;  %s586_s30 = scalar_lea.hbm %s826_s3, 16 }
  0x29   : > { %279 = vmatpush.msra.mxu0 %v254_v2  ;;  %p583_p1 = scmp.ne.s32.totalorder %s581_s15, %s582_s25  ;;  %p587_p10 = scmp.lt.s32.totalorder %s581_s15, %s826_s3 }
  0x2a   : > { %p588_p11 = scmp.lt.s32.totalorder %s586_s30, %s582_s25 }
  0x2b   : > { %280 = vmatpush.msra.mxu0 %v253_v3  ;;  %p584_p3 = pnand %p583_p1, %p748_p4 }
  0x2c   : > { %425 = vmatmul.msk.f32.vlgmr.msra.gmra.mxu0 %vm261_vm0, %v252_v4  ;;  %p589_p12 = por %p588_p11, %p587_p10 }
  0x2d   : > { %p585_p9 = pneg %p584_p3 }
  0x2f   : > { %p590_p13 = pnand %p589_p12, %p585_p9 }
  0xa9   : > { %v282_v6 = vpop.f32.mrf.mxu0 }
  0xaa   : > { %v283_v7 = vadd.f32 %v505_v5, %v282_v6 }
  0xac   : > { %286 = vst.msk [vmem:[%s248_s21] sm:$0xff] %vm285_vm1, %v283_v7 }
  0xad   : > { %593 = shalt.err (!%p590_p13)
}
  0xae   : > { %436 = dma.vmem_to_hbm [thread:$0]  (%p748_p4), %s303_s22, 128, %s305_s18, %s288_s24  }
  0xaf PF: > { %s316_s28 = sand.u32 1, %s632_s12   ;;  %p447_p0 = pnand %p418_p6, %p756_p7 }
  0xb0   : > { %s317_s23 = scalar_lea.sflag [#allocation4], %s316_s28 }
  0xb1   : > { %p448_p2 = pneg %p447_p0 }
  0xb3   : > { %627 = dma.done.wait (%p448_p2), %s317_s23, 128  }
  0xb4   : > { %629 = vsyncadd (%p448_p2), %s317_s23, 4294967168  ;;  %s20_s17 = sadd.s32 1, %s652_s17   ;;  %s833_s12 = smov %s636_s13 }
  0xb5   : > { %p17_p5 = scmp.ge.s32.totalorder %s20_s17, 4   ;;  %s834_s13 = smov %s640_s14 }
  0xb6   : > { %s835_s14 = smov %s754_s8  ;;  %s836_s15 = smov %s648_s16 }
  0xb7   : > { %s837_s16 = smov %s839_s29  ;;  %19 = sbr.rel (!%p17_p5) target bundleno = 7 (0x7), region = 85 }
  0xbc   :  { %323 = vsyncpa [#allocation3], 1 }
  0xbd   :  { %325 = vsyncpa [#allocation3 + $0x1], 1 }
  0xbe   :  { %326 = vsyncpa [#allocation6], 1 }
  0xbf   :  { %327 = vsyncpa [#allocation4], 1 }
  0xc0   :  { %329 = vsyncpa [#allocation4 + $0x1], 1 }

</bundles_post_ra>
